<compile_context>
chip_gen: v5e
topology: v5e:2x2
jax: 0.10.0
libtpu: 0.0.40
codegen_flags: <defaults>
</compile_context>

<pallas_src>
import functools

import jax
import jax.numpy as jnp
from jax import lax
from jax.experimental import pallas as pl
from jax.experimental.pallas import tpu as pltpu


def _round_up(v, m):
    return (v + m - 1) // m * m


def _pca_kernel(x_ref, w_ref, corr_ref, o_ref, acc_ref):
    # x_ref:    (tm, tk)   input tile (native dtype)
    # w_ref:    (tn, tk)   weight tile, (out_dim, D) layout (native dtype)
    # corr_ref: (1,  tn)   precomputed mu @ W^T slice (f32)
    # o_ref:    (tm, tn)   output tile
    # acc_ref:  (tm, tn)   f32 accumulator scratch (resident across K)
    k = pl.program_id(2)

    @pl.when(k == 0)
    def _():
        acc_ref[...] = jnp.zeros_like(acc_ref)

    # Contract x's last dim with W's last dim (no materialized transpose).
    dn = (((1,), (1,)), ((), ()))
    acc_ref[...] += lax.dot_general(
        x_ref[...], w_ref[...], dn, preferred_element_type=jnp.float32)

    @pl.when(k == pl.num_programs(2) - 1)
    def _():
        # Centering applied post-matmul in f32: out = x@W^T - mu@W^T.
        o_ref[...] = (acc_ref[...] - corr_ref[...]).astype(o_ref.dtype)


@functools.partial(jax.jit, static_argnames=("tm_max", "tn_max", "tk_max"))
def approximate_pca(x, weight, *, tm_max=256, tn_max=256, tk_max=512):
    """x: any shape with leading batch dim; weight: (out_dim, in_dim)."""
    n = x.shape[0]
    x2d = x.reshape(n, -1)                       # glue: flatten, plain JAX
    d = x2d.shape[1]
    out_dim = weight.shape[0]
    out_dtype = x2d.dtype

    # ---- tiny XLA prologue: batch mean and correction row mu @ W^T --------
    mu = jnp.mean(x2d, axis=0, keepdims=True, dtype=jnp.float32)   # (1, D)
    corr = lax.dot_general(                                        # (1, out)
        mu, weight.astype(jnp.float32),
        dimension_numbers=(((1,), (1,)), ((), ())),
        preferred_element_type=jnp.float32)

    # ---- tile sizes (fit comfortably in the 16 MiB v5e scoped VMEM, scale
    #      up with problem size; out tiles are lane-dense multiples of 128) --
    tm = min(tm_max, _round_up(n, 8))
    tn = min(tn_max, _round_up(out_dim, 128))
    tk = min(tk_max, _round_up(d, 128))

    n_p = _round_up(n, tm)
    o_p = _round_up(out_dim, tn)
    d_p = _round_up(d, tk)

    # ---- pad to tile multiples (zeros are inert for the matmul; padded
    #      rows/cols are sliced off below; mu was computed over true N) ------
    if n_p != n or d_p != d:
        x2d = jnp.pad(x2d, ((0, n_p - n), (0, d_p - d)))
    w_p = weight
    if o_p != out_dim or d_p != d:
        w_p = jnp.pad(weight, ((0, o_p - out_dim), (0, d_p - d)))
    corr_p = corr
    if o_p != out_dim:
        corr_p = jnp.pad(corr, ((0, 0), (0, o_p - out_dim)))

    grid = (n_p // tm, o_p // tn, d_p // tk)
    itemsize = jnp.dtype(x2d.dtype).itemsize

    out_p = pl.pallas_call(
        _pca_kernel,
        out_shape=jax.ShapeDtypeStruct((n_p, o_p), out_dtype),
        grid_spec=pltpu.PrefetchScalarGridSpec(
            num_scalar_prefetch=0,
            grid=grid,
            in_specs=[
                pl.BlockSpec((tm, tk), lambda i, j, k: (i, k)),   # x tile
                pl.BlockSpec((tn, tk), lambda i, j, k: (j, k)),   # W tile
                pl.BlockSpec((1, tn), lambda i, j, k: (0, j)),    # corr row
            ],
            out_specs=pl.BlockSpec((tm, tn), lambda i, j, k: (i, j)),
            scratch_shapes=[pltpu.VMEM((tm, tn), jnp.float32)],
        ),
        compiler_params=pltpu.CompilerParams(
            dimension_semantics=("parallel", "parallel", "arbitrary")),
        cost_estimate=pl.CostEstimate(
            flops=2 * n_p * d_p * o_p,
            transcendentals=0,
            bytes_accessed=(n_p * d_p + o_p * d_p + n_p * o_p) * itemsize),
    )(x2d, w_p, corr_p)

    # strip padding
    return out_p[:n, :out_dim]


def _reference(x, weight):
    n = x.shape[0]
    x2d = x.reshape(n, -1)
    f = x2d - jnp.mean(x2d, axis=0, keepdims=True)
    return f @ weight.T


if __name__ == "__main__":
    key = jax.random.PRNGKey(0)
    k_x, k_w = jax.random.split(key)

    # small shapes consistent with the module: x is NCHW, flattened inside
    batch, c, h, w_sp = 2, 4, 16, 16
    in_dim = c * h * w_sp      # 1024
    out_dim = 32

    x = jax.random.normal(k_x, (batch, c, h, w_sp), dtype=jnp.float32)
    # deterministic "nn.Linear" weight, kaiming-uniform-ish bound
    bound = 1.0 / (in_dim ** 0.5)
    weight = jax.random.uniform(k_w, (out_dim, in_dim),
                                minval=-bound, maxval=bound,
                                dtype=jnp.float32)

    out = approximate_pca(x, weight)
    out = jax.block_until_ready(out)

    ref = _reference(x, weight)
    assert out.shape == (batch, out_dim), out.shape
    assert jnp.allclose(out, ref, atol=1e-4, rtol=1e-4)

    print("KERNEL_OK")
</pallas_src>

<mosaic_0001>
module attributes {stable_mosaic.version = 11 : i64} {
  func.func @_pca_kernel(%arg0: i32, %arg1: i32, %arg2: i32, %arg3: memref<8x512xf32, #tpu.memory_space<vmem>>, %arg4: memref<128x512xf32, #tpu.memory_space<vmem>>, %arg5: memref<1x128xf32, #tpu.memory_space<vmem>>, %arg6: memref<8x128xf32, #tpu.memory_space<vmem>>, %arg7: memref<8x128xf32, #tpu.memory_space<vmem>>) attributes {dimension_semantics = [#tpu.dimension_semantics<parallel>, #tpu.dimension_semantics<parallel>, #tpu.dimension_semantics<arbitrary>], iteration_bounds = array<i64: 1, 1, 2>, scalar_prefetch = 0 : i64, scratch_operands = 1 : i64, tpu.core_type = #tpu.core_type<tc>, window_params = [{transform_indices = @transform_0, window_bounds = array<i64: 8, 512>}, {transform_indices = @transform_1, window_bounds = array<i64: 128, 512>}, {transform_indices = @transform_2, window_bounds = array<i64: 1, 128>}, {transform_indices = @transform_3, window_bounds = array<i64: 8, 128>}]} {
    %c0_i32 = arith.constant 0 : i32
    %0 = arith.cmpi eq, %arg2, %c0_i32 : i32
    %1 = arith.extui %0 : i1 to i32
    %c0_i32_0 = arith.constant 0 : i32
    %2 = arith.cmpi ne, %1, %c0_i32_0 : i32
    scf.if %2 {
      %cst_9 = arith.constant 0.000000e+00 : f32
      %12 = vector.broadcast %cst_9 : f32 to vector<8x128xf32>
      %c0_10 = arith.constant 0 : index
      %c0_11 = arith.constant 0 : index
      %13 = vector.load %arg7[%c0_10, %c0_11] : memref<8x128xf32, #tpu.memory_space<vmem>>, vector<8x128xf32>
      tpu.vector_store %arg7[%c0_10, %c0_11], %12 {strides = array<i32>} : memref<8x128xf32, #tpu.memory_space<vmem>>, vector<8x128xf32>,
    } else {
    }
    %c0 = arith.constant 0 : index
    %c0_1 = arith.constant 0 : index
    %3 = vector.load %arg7[%c0, %c0_1] : memref<8x128xf32, #tpu.memory_space<vmem>>, vector<8x128xf32>
    %c0_2 = arith.constant 0 : index
    %c0_3 = arith.constant 0 : index
    %4 = vector.load %arg3[%c0_2, %c0_3] : memref<8x512xf32, #tpu.memory_space<vmem>>, vector<8x512xf32>
    %c0_4 = arith.constant 0 : index
    %c0_5 = arith.constant 0 : index
    %5 = vector.load %arg4[%c0_4, %c0_5] : memref<128x512xf32, #tpu.memory_space<vmem>>, vector<128x512xf32>
    %cst = arith.constant dense<0.000000e+00> : vector<8x128xf32>
    %6 = tpu.matmul %4, %5, %cst {dimension_numbers = #tpu.dot_dimension_numbers<[1], [1], [0], [0], [0, 0, 1, 0], [], []>} : vector<8x512xf32>, vector<128x512xf32>, vector<8x128xf32> -> vector<8x128xf32>
    %7 = arith.addf %3, %6 : vector<8x128xf32>
    %c0_6 = arith.constant 0 : index
    %c0_7 = arith.constant 0 : index
    %8 = vector.load %arg7[%c0_6, %c0_7] : memref<8x128xf32, #tpu.memory_space<vmem>>, vector<8x128xf32>
    tpu.vector_store %arg7[%c0_6, %c0_7], %7 {strides = array<i32>} : memref<8x128xf32, #tpu.memory_space<vmem>>, vector<8x128xf32>,
    %c1_i32 = arith.constant 1 : i32
    %9 = arith.cmpi eq, %arg2, %c1_i32 : i32
    %10 = arith.extui %9 : i1 to i32
    %c0_i32_8 = arith.constant 0 : i32
    %11 = arith.cmpi ne, %10, %c0_i32_8 : i32
    scf.if %11 {
      %c0_9 = arith.constant 0 : index
      %c0_10 = arith.constant 0 : index
      %12 = vector.load %arg7[%c0_9, %c0_10] : memref<8x128xf32, #tpu.memory_space<vmem>>, vector<8x128xf32>
      %c0_11 = arith.constant 0 : index
      %c0_12 = arith.constant 0 : index
      %13 = vector.load %arg5[%c0_11, %c0_12] : memref<1x128xf32, #tpu.memory_space<vmem>>, vector<1x128xf32>
      %14 = vector.broadcast %13 : vector<1x128xf32> to vector<8x128xf32>
      %15 = arith.subf %12, %14 : vector<8x128xf32>
      %c0_13 = arith.constant 0 : index
      %c0_14 = arith.constant 0 : index
      %16 = vector.load %arg6[%c0_13, %c0_14] : memref<8x128xf32, #tpu.memory_space<vmem>>, vector<8x128xf32>
      tpu.vector_store %arg6[%c0_13, %c0_14], %15 {strides = array<i32>} : memref<8x128xf32, #tpu.memory_space<vmem>>, vector<8x128xf32>,
    } else {
    }
    return
  }
  func.func @transform_0(%arg0: i32, %arg1: i32, %arg2: i32) -> (i32, i32) {
    %c0_i32 = arith.constant 0 : i32
    return %arg0, %arg2 : i32, i32
  }
  func.func @transform_1(%arg0: i32, %arg1: i32, %arg2: i32) -> (i32, i32) {
    %c0_i32 = arith.constant 0 : i32
    return %arg1, %arg2 : i32, i32
  }
  func.func @transform_2(%arg0: i32, %arg1: i32, %arg2: i32) -> (i32, i32) {
    %c0_i32 = arith.constant 0 : i32
    %c0_i32_0 = arith.constant 0 : i32
    return %c0_i32, %arg1 : i32, i32
  }
  func.func @transform_3(%arg0: i32, %arg1: i32, %arg2: i32) -> (i32, i32) {
    %c0_i32 = arith.constant 0 : i32
    return %arg0, %arg1 : i32, i32
  }
}

</mosaic_0001>

<bundles_post_ra>
// kernel: approximate_pca.1
= control target key start
LH: loop header
LB: loop body
LE: loop exit
PB: predicated region body
PF: predicated region fallthrough
CT: control target
= control target key end

     0   :  { %s797_s12 = smov 0   ;;  %s799_s13 = smov 0   ;;  %s1074_s0 = inlined_call_operand.vmem [shape: f32[8,1024], index: 0, kind: input, shape index: {}]   ;;  %s1075_s1 = inlined_call_operand.vmem [shape: f32[128,1024], index: 1, kind: input, shape index: {}]   ;;  %s1076_s2 = inlined_call_operand.vmem [shape: f32[1,128], index: 2, kind: input, shape index: {}]   ;;  %s1077_s3 = inlined_call_operand.vmem [shape: f32[8,128], index: 3, kind: output, shape index: {}]  }
   0x1   :  { %s801_s14 = smov 0   ;;  %s803_s15 = smov 0  }
   0x2   :  { %s805_s16 = smov 0  }
   0x3 LB: > { %s25_s17 = sadd.s32 1, %s770_s15  ;;  %p76_p1 = scmp.ne.s32.totalorder %s762_s13, %s758_s12  ;;  %s774_s16 = sphi %s805_s16, %s13_s16   ;;  %s770_s15 = sphi %s803_s15, %s1081_s15   ;;  %s766_s14 = sphi %s801_s14, %s1080_s14   ;;  %s762_s13 = sphi %s799_s13, %s1079_s13   ;;  %s758_s12 = sphi %s797_s12, %s1078_s12  }
   0x4   : > { %p26_p0 = scmp.ge.s32.totalorder %s25_s17, 2  ;;  %p77_p2 = scmp.eq.s32.totalorder %s774_s16, 0 }
   0x5   : > { %s69_s19 = sadd.s32 1, %s762_s13  ;;  %p680_p5 = scmp.ge.s32.totalorder %s774_s16, 2 }
   0x6   : > { %s1083_s17 = smov (%p26_p0, %s25_s17), 0  ;;  %p78_p3 = por %p77_p2, %p76_p1 }
   0x7   : > { %s65_s18 = ssub.s32 %s770_s15, %s1083_s17  ;;  %162 = sbr.rel (%p680_p5) target bundleno = 80 (0x50), region = 20 }
   0x8   : > { %p67_p4 = scmp.eq.s32.totalorder %s65_s18, 0 }
   0xa   : > { %s832_s20 = scalar_select %p67_p4, %s762_s13, %s69_s19  }
   0xc   : > { %178 = sbr.rel (!%p78_p3) target bundleno = 80 (0x50), region = 28  ;;  %s180_s21 = sand.u32 (%p78_p3), 1, %s762_s13  }
   0xd   : > { %s693_s22 = sshll.u32 (%p78_p3), %s770_s15, 5  ;;  %s681_s23 = sshll.u32 (%p78_p3), %s180_s21, 9 }
   0xe   : > { %s840_s26 = scalar_lea.vmem (%p78_p3), %s1075_s1, %s693_s22  ;;  %s845_s27 = scalar_lea.vmem (%p78_p3), [#allocation3], %s681_s23 }
   0xf   : > { %v201_v0 = vld [vmem:[%s840_s26] sm:$0xff] (%p78_p3)  ;;  %v203_v1 = vld [vmem:[%s840_s26 + $0x8] sm:$0xff] (%p78_p3)  ;;  %v205_v2 = vld [vmem:[%s840_s26 + $0x10] sm:$0xff] (%p78_p3) }
  0x10   : > { %202 = vst [vmem:[%s845_s27] sm:$0xff] (%p78_p3), %v201_v0  ;;  %v207_v3 = vld [vmem:[%s840_s26 + $0x18] sm:$0xff] (%p78_p3)  ;;  %v209_v4 = vld [vmem:[%s840_s26 + $0x40] sm:$0xff] (%p78_p3)  ;;  %v211_v5 = vld [vmem:[%s840_s26 + $0x48] sm:$0xff] (%p78_p3) }
  0x11   : > { %204 = vst [vmem:[%s845_s27 + $0x8] sm:$0xff] %v203_v1  ;;  %v213_v6 = vld [vmem:[%s840_s26 + $0x50] sm:$0xff]  ;;  %v215_v7 = vld [vmem:[%s840_s26 + $0x58] sm:$0xff]  ;;  %v217_v8 = vld [vmem:[%s840_s26 + $0x80] sm:$0xff] }
  0x12   : > { %206 = vst [vmem:[%s845_s27 + $0x10] sm:$0xff] %v205_v2  ;;  %v219_v9 = vld [vmem:[%s840_s26 + $0x88] sm:$0xff]  ;;  %v221_v10 = vld [vmem:[%s840_s26 + $0x90] sm:$0xff]  ;;  %v223_v11 = vld [vmem:[%s840_s26 + $0x98] sm:$0xff] }
  0x13   : > { %208 = vst [vmem:[%s845_s27 + $0x18] sm:$0xff] %v207_v3  ;;  %v225_v12 = vld [vmem:[%s840_s26 + $0xc0] sm:$0xff]  ;;  %v227_v13 = vld [vmem:[%s840_s26 + $0xc8] sm:$0xff]  ;;  %v229_v14 = vld [vmem:[%s840_s26 + $0xd0] sm:$0xff] }
  0x14   : > { %210 = vst [vmem:[%s845_s27 + $0x20] sm:$0xff] %v209_v4  ;;  %v231_v15 = vld [vmem:[%s840_s26 + $0xd8] sm:$0xff]  ;;  %v233_v16 = vld [vmem:[%s840_s26 + $0x100] sm:$0xff]  ;;  %v235_v17 = vld [vmem:[%s840_s26 + $0x108] sm:$0xff] }
  0x15   : > { %212 = vst [vmem:[%s845_s27 + $0x28] sm:$0xff] %v211_v5  ;;  %v237_v18 = vld [vmem:[%s840_s26 + $0x110] sm:$0xff]  ;;  %v239_v19 = vld [vmem:[%s840_s26 + $0x118] sm:$0xff]  ;;  %v241_v20 = vld [vmem:[%s840_s26 + $0x140] sm:$0xff] }
  0x16   : > { %214 = vst [vmem:[%s845_s27 + $0x30] sm:$0xff] %v213_v6  ;;  %v243_v21 = vld [vmem:[%s840_s26 + $0x148] sm:$0xff]  ;;  %v245_v22 = vld [vmem:[%s840_s26 + $0x150] sm:$0xff]  ;;  %v247_v23 = vld [vmem:[%s840_s26 + $0x158] sm:$0xff] }
  0x17   : > { %216 = vst [vmem:[%s845_s27 + $0x38] sm:$0xff] %v215_v7  ;;  %v249_v24 = vld [vmem:[%s840_s26 + $0x180] sm:$0xff]  ;;  %v251_v25 = vld [vmem:[%s840_s26 + $0x188] sm:$0xff]  ;;  %v253_v26 = vld [vmem:[%s840_s26 + $0x190] sm:$0xff] }
  0x18   : > { %218 = vst [vmem:[%s845_s27 + $0x40] sm:$0xff] %v217_v8  ;;  %v255_v27 = vld [vmem:[%s840_s26 + $0x198] sm:$0xff]  ;;  %v257_v28 = vld [vmem:[%s840_s26 + $0x1c0] sm:$0xff]  ;;  %v259_v29 = vld [vmem:[%s840_s26 + $0x1c8] sm:$0xff] }
  0x19   : > { %220 = vst [vmem:[%s845_s27 + $0x48] sm:$0xff] %v219_v9  ;;  %v261_v30 = vld [vmem:[%s840_s26 + $0x1d0] sm:$0xff]  ;;  %v263_v31 = vld [vmem:[%s840_s26 + $0x1d8] sm:$0xff]  ;;  %v265_v32 = vld [vmem:[%s840_s26 + $0x200] sm:$0xff] }
  0x1a   : > { %222 = vst [vmem:[%s845_s27 + $0x50] sm:$0xff] %v221_v10  ;;  %v267_v33 = vld [vmem:[%s840_s26 + $0x208] sm:$0xff]  ;;  %v269_v34 = vld [vmem:[%s840_s26 + $0x210] sm:$0xff]  ;;  %v271_v35 = vld [vmem:[%s840_s26 + $0x218] sm:$0xff] }
  0x1b   : > { %224 = vst [vmem:[%s845_s27 + $0x58] sm:$0xff] %v223_v11  ;;  %v273_v36 = vld [vmem:[%s840_s26 + $0x240] sm:$0xff]  ;;  %v275_v37 = vld [vmem:[%s840_s26 + $0x248] sm:$0xff]  ;;  %v277_v38 = vld [vmem:[%s840_s26 + $0x250] sm:$0xff] }
  0x1c   : > { %226 = vst [vmem:[%s845_s27 + $0x60] sm:$0xff] %v225_v12  ;;  %v279_v39 = vld [vmem:[%s840_s26 + $0x258] sm:$0xff]  ;;  %v281_v40 = vld [vmem:[%s840_s26 + $0x280] sm:$0xff]  ;;  %v283_v41 = vld [vmem:[%s840_s26 + $0x288] sm:$0xff] }
  0x1d   : > { %228 = vst [vmem:[%s845_s27 + $0x68] sm:$0xff] %v227_v13  ;;  %v285_v42 = vld [vmem:[%s840_s26 + $0x290] sm:$0xff]  ;;  %v287_v43 = vld [vmem:[%s840_s26 + $0x298] sm:$0xff]  ;;  %v289_v44 = vld [vmem:[%s840_s26 + $0x2c0] sm:$0xff] }
  0x1e   : > { %230 = vst [vmem:[%s845_s27 + $0x70] sm:$0xff] %v229_v14  ;;  %v291_v45 = vld [vmem:[%s840_s26 + $0x2c8] sm:$0xff]  ;;  %v293_v46 = vld [vmem:[%s840_s26 + $0x2d0] sm:$0xff]  ;;  %v295_v47 = vld [vmem:[%s840_s26 + $0x2d8] sm:$0xff] }
  0x1f   : > { %232 = vst [vmem:[%s845_s27 + $0x78] sm:$0xff] %v231_v15  ;;  %v297_v48 = vld [vmem:[%s840_s26 + $0x300] sm:$0xff]  ;;  %v299_v49 = vld [vmem:[%s840_s26 + $0x308] sm:$0xff]  ;;  %v301_v50 = vld [vmem:[%s840_s26 + $0x310] sm:$0xff] }
  0x20   : > { %234 = vst [vmem:[%s845_s27 + $0x80] sm:$0xff] %v233_v16  ;;  %v303_v51 = vld [vmem:[%s840_s26 + $0x318] sm:$0xff]  ;;  %v305_v52 = vld [vmem:[%s840_s26 + $0x340] sm:$0xff]  ;;  %v307_v53 = vld [vmem:[%s840_s26 + $0x348] sm:$0xff] }
  0x21   : > { %236 = vst [vmem:[%s845_s27 + $0x88] sm:$0xff] %v235_v17  ;;  %v309_v54 = vld [vmem:[%s840_s26 + $0x350] sm:$0xff]  ;;  %v311_v55 = vld [vmem:[%s840_s26 + $0x358] sm:$0xff]  ;;  %v313_v56 = vld [vmem:[%s840_s26 + $0x380] sm:$0xff] }
  0x22   : > { %238 = vst [vmem:[%s845_s27 + $0x90] sm:$0xff] %v237_v18  ;;  %v315_v57 = vld [vmem:[%s840_s26 + $0x388] sm:$0xff]  ;;  %v317_v58 = vld [vmem:[%s840_s26 + $0x390] sm:$0xff]  ;;  %v319_v59 = vld [vmem:[%s840_s26 + $0x398] sm:$0xff] }
  0x23   : > { %240 = vst [vmem:[%s845_s27 + $0x98] sm:$0xff] %v239_v19  ;;  %v321_v60 = vld [vmem:[%s840_s26 + $0x3c0] sm:$0xff]  ;;  %v323_v61 = vld [vmem:[%s840_s26 + $0x3c8] sm:$0xff]  ;;  %v325_v62 = vld [vmem:[%s840_s26 + $0x3d0] sm:$0xff] }
  0x24   : > { %242 = vst [vmem:[%s845_s27 + $0xa0] sm:$0xff] %v241_v20  ;;  %v327_v63 = vld [vmem:[%s840_s26 + $0x3d8] sm:$0xff] }
  0x25   : > { %244 = vst [vmem:[%s845_s27 + $0xa8] sm:$0xff] %v243_v21 }
  0x26   : > { %246 = vst [vmem:[%s845_s27 + $0xb0] sm:$0xff] %v245_v22 }
  0x27   : > { %248 = vst [vmem:[%s845_s27 + $0xb8] sm:$0xff] %v247_v23 }
  0x28   : > { %250 = vst [vmem:[%s845_s27 + $0xc0] sm:$0xff] %v249_v24 }
  0x29   : > { %252 = vst [vmem:[%s845_s27 + $0xc8] sm:$0xff] %v251_v25 }
  0x2a   : > { %254 = vst [vmem:[%s845_s27 + $0xd0] sm:$0xff] %v253_v26 }
  0x2b   : > { %256 = vst [vmem:[%s845_s27 + $0xd8] sm:$0xff] %v255_v27 }
  0x2c   : > { %258 = vst [vmem:[%s845_s27 + $0xe0] sm:$0xff] %v257_v28 }
  0x2d   : > { %260 = vst [vmem:[%s845_s27 + $0xe8] sm:$0xff] %v259_v29 }
  0x2e   : > { %262 = vst [vmem:[%s845_s27 + $0xf0] sm:$0xff] %v261_v30 }
  0x2f   : > { %264 = vst [vmem:[%s845_s27 + $0xf8] sm:$0xff] %v263_v31 }
  0x30   : > { %266 = vst [vmem:[%s845_s27 + $0x100] sm:$0xff] %v265_v32 }
  0x31   : > { %268 = vst [vmem:[%s845_s27 + $0x108] sm:$0xff] %v267_v33 }
  0x32   : > { %270 = vst [vmem:[%s845_s27 + $0x110] sm:$0xff] %v269_v34 }
  0x33   : > { %272 = vst [vmem:[%s845_s27 + $0x118] sm:$0xff] %v271_v35 }
  0x34   : > { %274 = vst [vmem:[%s845_s27 + $0x120] sm:$0xff] %v273_v36 }
  0x35   : > { %276 = vst [vmem:[%s845_s27 + $0x128] sm:$0xff] %v275_v37 }
  0x36   : > { %278 = vst [vmem:[%s845_s27 + $0x130] sm:$0xff] %v277_v38 }
  0x37   : > { %280 = vst [vmem:[%s845_s27 + $0x138] sm:$0xff] %v279_v39 }
  0x38   : > { %282 = vst [vmem:[%s845_s27 + $0x140] sm:$0xff] %v281_v40 }
  0x39   : > { %284 = vst [vmem:[%s845_s27 + $0x148] sm:$0xff] %v283_v41 }
  0x3a   : > { %286 = vst [vmem:[%s845_s27 + $0x150] sm:$0xff] %v285_v42 }
  0x3b   : > { %288 = vst [vmem:[%s845_s27 + $0x158] sm:$0xff] %v287_v43 }
  0x3c   : > { %290 = vst [vmem:[%s845_s27 + $0x160] sm:$0xff] %v289_v44 }
  0x3d   : > { %292 = vst [vmem:[%s845_s27 + $0x168] sm:$0xff] %v291_v45 }
  0x3e   : > { %294 = vst [vmem:[%s845_s27 + $0x170] sm:$0xff] %v293_v46 }
  0x3f   : > { %296 = vst [vmem:[%s845_s27 + $0x178] sm:$0xff] %v295_v47 }
  0x40   : > { %298 = vst [vmem:[%s845_s27 + $0x180] sm:$0xff] %v297_v48 }
  0x41   : > { %300 = vst [vmem:[%s845_s27 + $0x188] sm:$0xff] %v299_v49 }
  0x42   : > { %302 = vst [vmem:[%s845_s27 + $0x190] sm:$0xff] %v301_v50 }
  0x43   : > { %304 = vst [vmem:[%s845_s27 + $0x198] sm:$0xff] %v303_v51 }
  0x44   : > { %306 = vst [vmem:[%s845_s27 + $0x1a0] sm:$0xff] %v305_v52 }
  0x45   : > { %308 = vst [vmem:[%s845_s27 + $0x1a8] sm:$0xff] %v307_v53 }
  0x46   : > { %310 = vst [vmem:[%s845_s27 + $0x1b0] sm:$0xff] %v309_v54 }
  0x47   : > { %312 = vst [vmem:[%s845_s27 + $0x1b8] sm:$0xff] %v311_v55 }
  0x48   : > { %314 = vst [vmem:[%s845_s27 + $0x1c0] sm:$0xff] %v313_v56 }
  0x49   : > { %316 = vst [vmem:[%s845_s27 + $0x1c8] sm:$0xff] %v315_v57 }
  0x4a   : > { %318 = vst [vmem:[%s845_s27 + $0x1d0] sm:$0xff] %v317_v58 }
  0x4b   : > { %320 = vst [vmem:[%s845_s27 + $0x1d8] sm:$0xff] %v319_v59 }
  0x4c   : > { %322 = vst [vmem:[%s845_s27 + $0x1e0] sm:$0xff] %v321_v60 }
  0x4d   : > { %324 = vst [vmem:[%s845_s27 + $0x1e8] sm:$0xff] %v323_v61 }
  0x4e   : > { %326 = vst [vmem:[%s845_s27 + $0x1f0] sm:$0xff] %v325_v62 }
  0x4f   : > { %328 = vst [vmem:[%s845_s27 + $0x1f8] sm:$0xff] %v327_v63 }
  0x50 PF: > { %p684_p6 = scmp.ge.s32.totalorder %s774_s16, 1  ;;  %p333_p7 = scmp.lt.s32.totalorder %s774_s16, 3 }
  0x52   : > { %p334_p8 = pnand %p684_p6, %p333_p7 }
  0x53   : > { %s340_s28 = sand.u32 (!%p334_p8), 1, %s758_s12   ;;  %s686_s29 = sshll.u32 (!%p334_p8), %s766_s14, 2 }
  0x54   : > { %337 = sbr.rel (%p334_p8) target bundleno = 309 (0x135), region = 51  ;;  %s685_s30 = sshll.u32 (!%p334_p8), %s340_s28, 9 }
  0x55   : > { %p380_p9 = scmp.lt.s32.totalorder (!%p334_p8), %s686_s29, 7  ;;  %s981_s8 = scalar_lea.vmem (!%p334_p8), [#allocation3], %s685_s30 }
  0x56   : > { %p688_p10 = scmp.ne.s32.totalorder (!%p334_p8), %s766_s14, 0 }
  0x59   : > { %s1085_s29 = smov (!%p380_p9, %s686_s29), 7  ;;  %402 = sbr.rel (%p688_p10) target bundleno = 96 (0x60), region = 59 }
  0x5a   : > { %s687_s4 = sshll.u32 %s1085_s29, 3 }
  0x5b   : > { %s979_s7 = scalar_lea.vmem %s1074_s0, %s687_s4 }
  0x5e   : > { %v776_v0 = vmov 0.0  }
  0x5f   : > { %403 = vst [vmem:[#allocation2] sm:$0xff] %v776_v0 }
  0x60 PF: > { %v471_v1 = vld [vmem:[%s981_s8 + $0x1f0] sm:$0xff]  ;;  %v472_v2 = vld [vmem:[%s981_s8 + $0x1f8] sm:$0xff]  ;;  %v469_v3 = vld [vmem:[%s981_s8 + $0x1e0] sm:$0xff]  ;;  %p689_p11 = scmp.ne.s32.totalorder %s766_s14, 1 }
  0x61   : > { %513 = vmatpush.xpose.msra.mxu2 %v471_v1  ;;  %533 = vmatpush.xpose.msra.mxu3 %v472_v2  ;;  %v470_v4 = vld [vmem:[%s981_s8 + $0x1e8] sm:$0xff]  ;;  %v467_v5 = vld [vmem:[%s981_s8 + $0x1d0] sm:$0xff]  ;;  %v468_v6 = vld [vmem:[%s981_s8 + $0x1d8] sm:$0xff] }
  0x62   : > { %473 = vmatpush.xpose.msra.mxu0 %v469_v3  ;;  %493 = vmatpush.xpose.msra.mxu1 %v470_v4  ;;  %v465_v7 = vld [vmem:[%s981_s8 + $0x1c0] sm:$0xff]  ;;  %v466_v8 = vld [vmem:[%s981_s8 + $0x1c8] sm:$0xff]  ;;  %v463_v9 = vld [vmem:[%s981_s8 + $0x1b0] sm:$0xff] }
  0x63   : > { %v464_v10 = vld [vmem:[%s981_s8 + $0x1b8] sm:$0xff]  ;;  %v461_v11 = vld [vmem:[%s981_s8 + $0x1a0] sm:$0xff]  ;;  %v462_v12 = vld [vmem:[%s981_s8 + $0x1a8] sm:$0xff] }
  0x64   : > { %v459_v13 = vld [vmem:[%s981_s8 + $0x190] sm:$0xff]  ;;  %v460_v14 = vld [vmem:[%s981_s8 + $0x198] sm:$0xff]  ;;  %v457_v15 = vld [vmem:[%s981_s8 + $0x180] sm:$0xff] }
  0x65   : > { %514 = vmatpush.xpose.msra.mxu2 %v467_v5  ;;  %534 = vmatpush.xpose.msra.mxu3 %v468_v6  ;;  %v458_v16 = vld [vmem:[%s981_s8 + $0x188] sm:$0xff]  ;;  %v455_v17 = vld [vmem:[%s981_s8 + $0x170] sm:$0xff]  ;;  %v456_v18 = vld [vmem:[%s981_s8 + $0x178] sm:$0xff] }
  0x66   : > { %474 = vmatpush.xpose.msra.mxu0 %v465_v7  ;;  %494 = vmatpush.xpose.msra.mxu1 %v466_v8  ;;  %v453_v19 = vld [vmem:[%s981_s8 + $0x160] sm:$0xff]  ;;  %v454_v20 = vld [vmem:[%s981_s8 + $0x168] sm:$0xff]  ;;  %v451_v21 = vld [vmem:[%s981_s8 + $0x150] sm:$0xff] }
  0x67   : > { %v452_v22 = vld [vmem:[%s981_s8 + $0x158] sm:$0xff]  ;;  %v449_v23 = vld [vmem:[%s981_s8 + $0x140] sm:$0xff]  ;;  %v450_v24 = vld [vmem:[%s981_s8 + $0x148] sm:$0xff] }
  0x68   : > { %v447_v25 = vld [vmem:[%s981_s8 + $0x130] sm:$0xff]  ;;  %v448_v26 = vld [vmem:[%s981_s8 + $0x138] sm:$0xff]  ;;  %v445_v27 = vld [vmem:[%s981_s8 + $0x120] sm:$0xff] }
  0x69   : > { %515 = vmatpush.xpose.msra.mxu2 %v463_v9  ;;  %535 = vmatpush.xpose.msra.mxu3 %v464_v10  ;;  %v446_v28 = vld [vmem:[%s981_s8 + $0x128] sm:$0xff]  ;;  %v443_v29 = vld [vmem:[%s981_s8 + $0x110] sm:$0xff]  ;;  %v444_v30 = vld [vmem:[%s981_s8 + $0x118] sm:$0xff] }
  0x6a   : > { %475 = vmatpush.xpose.msra.mxu0 %v461_v11  ;;  %495 = vmatpush.xpose.msra.mxu1 %v462_v12  ;;  %v441_v31 = vld [vmem:[%s981_s8 + $0x100] sm:$0xff]  ;;  %v442_v32 = vld [vmem:[%s981_s8 + $0x108] sm:$0xff]  ;;  %v439_v33 = vld [vmem:[%s981_s8 + $0xf0] sm:$0xff] }
  0x6b   : > { %v440_v34 = vld [vmem:[%s981_s8 + $0xf8] sm:$0xff]  ;;  %v437_v35 = vld [vmem:[%s981_s8 + $0xe0] sm:$0xff]  ;;  %v438_v36 = vld [vmem:[%s981_s8 + $0xe8] sm:$0xff] }
  0x6c   : > { %v435_v37 = vld [vmem:[%s981_s8 + $0xd0] sm:$0xff]  ;;  %v436_v38 = vld [vmem:[%s981_s8 + $0xd8] sm:$0xff]  ;;  %v433_v39 = vld [vmem:[%s981_s8 + $0xc0] sm:$0xff] }
  0x6d   : > { %516 = vmatpush.xpose.msra.mxu2 %v459_v13  ;;  %536 = vmatpush.xpose.msra.mxu3 %v460_v14  ;;  %v434_v40 = vld [vmem:[%s981_s8 + $0xc8] sm:$0xff]  ;;  %v431_v41 = vld [vmem:[%s981_s8 + $0xb0] sm:$0xff]  ;;  %v432_v42 = vld [vmem:[%s981_s8 + $0xb8] sm:$0xff] }
  0x6e   : > { %476 = vmatpush.xpose.msra.mxu0 %v457_v15  ;;  %496 = vmatpush.xpose.msra.mxu1 %v458_v16  ;;  %v429_v43 = vld [vmem:[%s981_s8 + $0xa0] sm:$0xff]  ;;  %v430_v44 = vld [vmem:[%s981_s8 + $0xa8] sm:$0xff]  ;;  %v427_v45 = vld [vmem:[%s981_s8 + $0x90] sm:$0xff] }
  0x6f   : > { %v428_v46 = vld [vmem:[%s981_s8 + $0x98] sm:$0xff]  ;;  %v425_v47 = vld [vmem:[%s981_s8 + $0x80] sm:$0xff]  ;;  %v426_v48 = vld [vmem:[%s981_s8 + $0x88] sm:$0xff] }
  0x70   : > { %v423_v49 = vld [vmem:[%s981_s8 + $0x70] sm:$0xff]  ;;  %v424_v50 = vld [vmem:[%s981_s8 + $0x78] sm:$0xff]  ;;  %v421_v51 = vld [vmem:[%s981_s8 + $0x60] sm:$0xff] }
  0x71   : > { %517 = vmatpush.xpose.msra.mxu2 %v455_v17  ;;  %537 = vmatpush.xpose.msra.mxu3 %v456_v18  ;;  %v422_v52 = vld [vmem:[%s981_s8 + $0x68] sm:$0xff]  ;;  %v419_v53 = vld [vmem:[%s981_s8 + $0x50] sm:$0xff]  ;;  %v420_v54 = vld [vmem:[%s981_s8 + $0x58] sm:$0xff] }
  0x72   : > { %477 = vmatpush.xpose.msra.mxu0 %v453_v19  ;;  %497 = vmatpush.xpose.msra.mxu1 %v454_v20  ;;  %v417_v55 = vld [vmem:[%s981_s8 + $0x40] sm:$0xff]  ;;  %v418_v56 = vld [vmem:[%s981_s8 + $0x48] sm:$0xff]  ;;  %v415_v57 = vld [vmem:[%s981_s8 + $0x30] sm:$0xff] }
  0x73   : > { %v416_v58 = vld [vmem:[%s981_s8 + $0x38] sm:$0xff]  ;;  %v413_v59 = vld [vmem:[%s981_s8 + $0x20] sm:$0xff]  ;;  %v414_v60 = vld [vmem:[%s981_s8 + $0x28] sm:$0xff] }
  0x74   : > { %v411_v61 = vld [vmem:[%s981_s8 + $0x10] sm:$0xff]  ;;  %v412_v62 = vld [vmem:[%s981_s8 + $0x18] sm:$0xff]  ;;  %v409_v63 = vld [vmem:[%s981_s8] sm:$0xff] }
  0x75   : > { %518 = vmatpush.xpose.msra.mxu2 %v451_v21  ;;  %538 = vmatpush.xpose.msra.mxu3 %v452_v22  ;;  %v410_v0 = vld [vmem:[%s981_s8 + $0x8] sm:$0xff]  ;;  %v408_v2 = vld [vmem:[%s979_s7 + $0x18] sm:$0xff]  ;;  %v405_v3 = vld [vmem:[%s979_s7] sm:$0xff] }
  0x76   : > { %478 = vmatpush.xpose.msra.mxu0 %v449_v23  ;;  %498 = vmatpush.xpose.msra.mxu1 %v450_v24  ;;  %v407_v1 = vld [vmem:[%s979_s7 + $0x10] sm:$0xff]  ;;  %v406_v4 = vld [vmem:[%s979_s7 + $0x8] sm:$0xff]  ;;  %v404_v11 = vld [vmem:[#allocation2] sm:$0xff] }
  0x79   : > { %519 = vmatpush.xpose.msra.mxu2 %v447_v25  ;;  %539 = vmatpush.xpose.msra.mxu3 %v448_v26 }
  0x7a   : > { %479 = vmatpush.xpose.msra.mxu0 %v445_v27  ;;  %499 = vmatpush.xpose.msra.mxu1 %v446_v28 }
  0x7d   : > { %520 = vmatpush.xpose.msra.mxu2 %v443_v29  ;;  %540 = vmatpush.xpose.msra.mxu3 %v444_v30 }
  0x7e   : > { %480 = vmatpush.xpose.msra.mxu0 %v441_v31  ;;  %500 = vmatpush.xpose.msra.mxu1 %v442_v32 }
  0x81   : > { %521 = vmatpush.xpose.msra.mxu2 %v439_v33  ;;  %541 = vmatpush.xpose.msra.mxu3 %v440_v34 }
  0x82   : > { %481 = vmatpush.xpose.msra.mxu0 %v437_v35  ;;  %501 = vmatpush.xpose.msra.mxu1 %v438_v36 }
  0x85   : > { %522 = vmatpush.xpose.msra.mxu2 %v435_v37  ;;  %542 = vmatpush.xpose.msra.mxu3 %v436_v38 }
  0x86   : > { %482 = vmatpush.xpose.msra.mxu0 %v433_v39  ;;  %502 = vmatpush.xpose.msra.mxu1 %v434_v40 }
  0x89   : > { %523 = vmatpush.xpose.msra.mxu2 %v431_v41  ;;  %543 = vmatpush.xpose.msra.mxu3 %v432_v42 }
  0x8a   : > { %483 = vmatpush.xpose.msra.mxu0 %v429_v43  ;;  %503 = vmatpush.xpose.msra.mxu1 %v430_v44 }
  0x8d   : > { %524 = vmatpush.xpose.msra.mxu2 %v427_v45  ;;  %544 = vmatpush.xpose.msra.mxu3 %v428_v46 }
  0x8e   : > { %484 = vmatpush.xpose.msra.mxu0 %v425_v47  ;;  %504 = vmatpush.xpose.msra.mxu1 %v426_v48 }
  0x91   : > { %525 = vmatpush.xpose.msra.mxu2 %v423_v49  ;;  %545 = vmatpush.xpose.msra.mxu3 %v424_v50 }
  0x92   : > { %485 = vmatpush.xpose.msra.mxu0 %v421_v51  ;;  %505 = vmatpush.xpose.msra.mxu1 %v422_v52 }
  0x95   : > { %526 = vmatpush.xpose.msra.mxu2 %v419_v53  ;;  %546 = vmatpush.xpose.msra.mxu3 %v420_v54 }
  0x96   : > { %486 = vmatpush.xpose.msra.mxu0 %v417_v55  ;;  %506 = vmatpush.xpose.msra.mxu1 %v418_v56 }
  0x99   : > { %527 = vmatpush.xpose.msra.mxu2 %v415_v57  ;;  %547 = vmatpush.xpose.msra.mxu3 %v416_v58 }
  0x9a   : > { %487 = vmatpush.xpose.msra.mxu0 %v413_v59  ;;  %507 = vmatpush.xpose.msra.mxu1 %v414_v60 }
  0x9d   : > { %528 = vmatpush.xpose.msra.mxu2 %v411_v61  ;;  %548 = vmatpush.xpose.msra.mxu3 %v412_v62 }
  0x9e   : > { %488 = vmatpush.xpose.msra.mxu0 %v409_v63  ;;  %508 = vmatpush.xpose.msra.mxu1 %v410_v0 }
  0xa0   : > { %529 = vmatmul.f32.vlgmr.msra.gmra.mxu2 %v407_v1  ;;  %549 = vmatmul.f32.vlgmr.msra.gmra.mxu3 %v408_v2 }
  0xa1   : > { %489 = vmatmul.f32.vlgmr.msra.gmra.mxu0 %v405_v3  ;;  %509 = vmatmul.f32.vlgmr.msra.gmra.mxu1 %v406_v4 }
 0x11e   : > { %v490_v5 = vpop.f32.mrf.mxu0  ;;  %v510_v6 = vpop.f32.mrf.mxu1 }
 0x11f   : > { %v511_v7 = vadd.f32 %v510_v6, %v490_v5 }
 0x123   : > { %v530_v8 = vpop.f32.mrf.mxu2  ;;  %v550_v9 = vpop.f32.mrf.mxu3 }
 0x124   : > { %v531_v10 = vadd.f32 %v530_v8, %v511_v7 }
 0x126   : > { %v551_v12 = vadd.f32 %v550_v9, %v531_v10  ;;  %558 = sbr.rel (%p689_p11) target bundleno = 309 (0x135), region = 63 }
 0x128   : > { %v553_v13 = vadd.f32 %v551_v12, %v404_v11 }
 0x12a   : > { %554 = vst [vmem:[#allocation2] sm:$0xff] %v553_v13 }
 0x12b   : > { %v735_v15 = vld [vmem:[%s1076_s2] ss:$0 sm:$0xff] }
 0x131   : > { %v559_v14 = vld [vmem:[#allocation2] sm:$0xff] }
 0x132   : > { %v564_v16 = vsub.f32 %v559_v14, %v735_v15 }
 0x134   : > { %565 = vst [vmem:[%s1077_s3] sm:$0xff] %v564_v16 }
 0x135 PF: > { %s13_s16 = sadd.s32 1, %s774_s16   ;;  %s1078_s12 = smov %s762_s13 }
 0x136   : > { %p10_p12 = scmp.ge.s32.totalorder %s13_s16, 4   ;;  %s1079_s13 = smov %s832_s20 }
 0x137   : > { %s1080_s14 = smov %s770_s15  ;;  %s1081_s15 = smov %s1083_s17 }
 0x138   :  { %12 = sbr.rel (!%p10_p12) target bundleno = 3 (0x3), region = 104 }

</bundles_post_ra>
